<compile_context>
chip_gen: v6e
topology: v6e:2x2x1
jax: 0.10.0
libtpu: 0.0.40
codegen_flags: <defaults>
</compile_context>

<pallas_src>
import math
import jax
import jax.numpy as jnp
from jax import lax
from jax.experimental import pallas as pl
from jax.experimental.pallas import tpu as pltpu

# ---------------- module configuration ----------------
IN_C = 4
OUT_C = 8
ADD_KERNEL = 1
STRIDE = 1
PAD = 0
RESIDUE_RATIO_IN = 0.3

KSIZE = STRIDE + ADD_KERNEL * 2          # 3
CONV_PAD = PAD + ADD_KERNEL              # 1
KKIC = KSIZE * KSIZE * IN_C              # 36
K_PAD = 40                               # KKIC + 1 (bias/ones row), padded to mult. of 8

N, H, W = 2, 16, 16                      # small synthetic shapes
HW = H * W                               # 256  (lane-dense: multiple of 128)
NHW = N * HW                             # 512

PRELU_INIT = 0.25
POST_MEAN = (1.0 - PRELU_INIT) / math.sqrt(2.0 * math.pi)
POST_EX2 = (1.0 + PRELU_INIT ** 2) / 2.0
POST_STDV = math.sqrt(POST_EX2 - POST_MEAN ** 2)

RES_RATIO = math.sqrt(RESIDUE_RATIO_IN)            # residue.mul(residue_ratio)
SC_RATIO = math.sqrt(1.0 - RESIDUE_RATIO_IN)       # shortcut.mul(shortcut_ratio)

POST_SCALE = RES_RATIO / POST_STDV                 # folded into residue weights (>0)
POST_BIAS = -POST_MEAN * RES_RATIO / POST_STDV     # folded into shortcut bias column


# ---------------- Pallas kernel ----------------
def residue_block_kernel(x_ref, w_ref, pw_ref, out_ref):
    # x_ref  : (K_PAD, N*HW)     im2col slab, whole batch along the lane axis
    #                            (rows 0..35 taps, row 36 ones, rows 37..39 zero pad)
    # w_ref  : (2*OUT_C, K_PAD)  combined folded weights
    #                            rows 0..OUT_C-1 residue, rows OUT_C.. shortcut(+POST_BIAS)
    # pw_ref : (OUT_C, 1)        PReLU per-channel slopes
    # out_ref: (N, OUT_C, HW)    lane-dense NCHW-flattened output
    y = jnp.dot(w_ref[...], x_ref[...], preferred_element_type=jnp.float32)  # (16, 512)
    v = y[:OUT_C, :]                                   # residue pre-activation
    sc = y[OUT_C:, :]                                  # shortcut (affine + POST_BIAS folded)
    out = jnp.where(v >= 0.0, v, v * pw_ref[...]) + sc  # (OUT_C, N*HW)

    nb, _, hw = out_ref.shape                          # static Python ints
    for b in range(nb):                                # lane-aligned full-vreg stores
        out_ref[b] = out[:, b * hw:(b + 1) * hw]


# ---------------- wrapper (jit-compiled as a whole) ----------------
def _residue_block(x_nchw, params):
    wres, bres, sres, ares, prelu_w, wsc, bsc, ssc, asc = params
    x = x_nchw.astype(jnp.float32)
    n = x.shape[0]
    nhw = n * HW

    # --- trace-time weight folding (affine scale/bias, ratios, CPReLU norm) ---
    wres_f = wres * (sres.reshape(1, 1, 1, OUT_C) * POST_SCALE)          # (K,K,IC,OC)
    bres_f = (bres * sres + ares) * POST_SCALE                           # (1, OC)
    wsc_f = wsc * (ssc.reshape(1, OUT_C) * SC_RATIO)                     # (IC, OC)
    bsc_f = (bsc * ssc + asc) * SC_RATIO + POST_BIAS                     # (1, OC) + CPReLU shift

    zpad = jnp.zeros((K_PAD - KKIC - 1, OUT_C), jnp.float32)             # (3, 8)
    res_cols = jnp.concatenate(
        [wres_f.reshape(KKIC, OUT_C), bres_f.reshape(1, OUT_C), zpad], axis=0)   # (40, 8)
    center = (CONV_PAD * KSIZE + CONV_PAD) * IN_C                        # rows of the 1x1 tap
    sc_rows = jnp.zeros((KKIC, OUT_C), jnp.float32).at[center:center + IN_C].set(wsc_f)
    sc_cols = jnp.concatenate([sc_rows, bsc_f.reshape(1, OUT_C), zpad], axis=0)  # (40, 8)
    w_comb = jnp.concatenate([res_cols, sc_cols], axis=1).T              # (16, 40)

    pw = prelu_w.reshape(OUT_C, 1)

    # --- im2col slab (K_PAD, N*HW): taps + ones row (bias) + zero pad rows ---
    xpad = jnp.pad(x, ((0, 0), (0, 0), (CONV_PAD, CONV_PAD), (CONV_PAD, CONV_PAD)))
    xpad_t = jnp.transpose(xpad, (1, 0, 2, 3))                           # (IC, N, H+2, W+2)
    cols = []
    for kh in range(KSIZE):
        for kw in range(KSIZE):
            win = lax.slice(xpad_t, (0, 0, kh, kw), (IN_C, n, kh + H, kw + W))
            cols.append(win.reshape(IN_C, nhw))                          # pure reshape
    cols.append(jnp.ones((1, nhw), jnp.float32))                         # bias via MXU ones row
    cols.append(jnp.zeros((K_PAD - KKIC - 1, nhw), jnp.float32))         # explicit K padding
    im2col = jnp.concatenate(cols, axis=0)                               # (40, N*HW)

    flops = 2 * (2 * OUT_C) * K_PAD * nhw
    bytes_accessed = 4 * (K_PAD * nhw + 2 * OUT_C * K_PAD + OUT_C + n * OUT_C * HW)

    out = pl.pallas_call(
        residue_block_kernel,
        out_shape=jax.ShapeDtypeStruct((n, OUT_C, HW), jnp.float32),
        grid_spec=pltpu.PrefetchScalarGridSpec(
            num_scalar_prefetch=0,
            grid=(1,),                                                   # one step, all gens
            in_specs=[
                pl.BlockSpec((K_PAD, nhw), lambda i: (0, 0)),
                pl.BlockSpec((2 * OUT_C, K_PAD), lambda i: (0, 0)),
                pl.BlockSpec((OUT_C, 1), lambda i: (0, 0)),
            ],
            out_specs=pl.BlockSpec((n, OUT_C, HW), lambda i: (0, 0, 0)),
        ),
        compiler_params=pltpu.CompilerParams(dimension_semantics=("arbitrary",)),
        cost_estimate=pl.CostEstimate(flops=flops, transcendentals=0,
                                      bytes_accessed=bytes_accessed),
    )(im2col, w_comb, pw)

    return out.reshape(n, OUT_C, H, W)                                   # already NCHW


residue_block = jax.jit(_residue_block)


# ---------------- deterministic parameter init (mirrors the PyTorch __init__) ----------------
def init_params(key):
    k1, k2 = jax.random.split(key)

    # residue Conv2d: normal_() then per-(oc, ic) spatial L2 normalization, bias zero
    w = jax.random.normal(k1, (OUT_C, IN_C, KSIZE, KSIZE), jnp.float32)
    w = w / jnp.sqrt(jnp.sum(w ** 2, axis=(2, 3), keepdims=True) + 1e-8)
    wres = jnp.transpose(w, (2, 3, 1, 0))             # OIHW -> HWIO
    bres = jnp.zeros((1, OUT_C), jnp.float32)

    # BatchStatistics(out_channels) -> Affine: scale=1, bias=0
    sres = jnp.ones((1, OUT_C), jnp.float32)
    ares = jnp.zeros((1, OUT_C), jnp.float32)

    # CPReLU
    prelu_w = jnp.full((1, OUT_C), PRELU_INIT, jnp.float32)

    # shortcut 1x1 Conv2d (in_channels != out_channels)
    w2 = jax.random.normal(k2, (OUT_C, IN_C, 1, 1), jnp.float32)
    w2 = w2 / jnp.sqrt(jnp.sum(w2 ** 2, axis=(2, 3), keepdims=True) + 1e-8)
    wsc = jnp.transpose(w2, (2, 3, 1, 0))[0, 0]       # (IN_C, OUT_C)
    bsc = jnp.zeros((1, OUT_C), jnp.float32)

    # shortcut BatchStatistics -> Affine
    ssc = jnp.ones((1, OUT_C), jnp.float32)
    asc = jnp.zeros((1, OUT_C), jnp.float32)

    return (wres, bres, sres, ares, prelu_w, wsc, bsc, ssc, asc)


# ---------------- pure-JAX reference (correctness check only) ----------------
def ref_forward(x_nchw, params):
    wres, bres, sres, ares, prelu_w, wsc, bsc, ssc, asc = params
    x = jnp.transpose(x_nchw, (0, 2, 3, 1)).astype(jnp.float32)
    res = lax.conv_general_dilated(
        x, wres, (STRIDE, STRIDE), [(CONV_PAD, CONV_PAD), (CONV_PAD, CONV_PAD)],
        dimension_numbers=("NHWC", "HWIO", "NHWC"),
        precision=lax.Precision.HIGHEST)
    res = res + bres.reshape(1, 1, 1, OUT_C)
    res = res * sres.reshape(1, 1, 1, OUT_C) + ares.reshape(1, 1, 1, OUT_C)
    res = jnp.where(res >= 0, res, res * prelu_w.reshape(1, 1, 1, OUT_C))
    res = (res - POST_MEAN) / POST_STDV
    sc = jnp.einsum("nhwc,cd->nhwd", x, wsc,
                    precision=lax.Precision.HIGHEST) + bsc.reshape(1, 1, 1, OUT_C)
    sc = sc * ssc.reshape(1, 1, 1, OUT_C) + asc.reshape(1, 1, 1, OUT_C)
    out = sc * SC_RATIO + res * RES_RATIO
    return jnp.transpose(out, (0, 3, 1, 2))


if __name__ == "__main__":
    key = jax.random.PRNGKey(0)
    kx, kp = jax.random.split(key)
    x = jax.random.normal(kx, (N, IN_C, H, W), jnp.float32)   # NCHW like PyTorch
    params = init_params(kp)

    out = residue_block(x, params)
    out = jax.block_until_ready(out)

    ref = jax.block_until_ready(ref_forward(x, params))
    assert out.shape == (N, OUT_C, H, W), out.shape
    assert jnp.allclose(out, ref, atol=5e-3, rtol=5e-3), float(jnp.max(jnp.abs(out - ref)))
    print("KERNEL_OK")
</pallas_src>

<mosaic_0001>
module attributes {stable_mosaic.version = 11 : i64} {
  func.func @residue_block_kernel(%arg0: i32, %arg1: memref<40x512xf32, #tpu.memory_space<vmem>>, %arg2: memref<16x40xf32, #tpu.memory_space<vmem>>, %arg3: memref<8x1xf32, #tpu.memory_space<vmem>>, %arg4: memref<2x8x256xf32, #tpu.memory_space<vmem>>) attributes {dimension_semantics = [#tpu.dimension_semantics<arbitrary>], iteration_bounds = array<i64: 1>, scalar_prefetch = 0 : i64, scratch_operands = 0 : i64, tpu.core_type = #tpu.core_type<tc>, window_params = [{pipeline_mode = #tpu.pipeline_mode<synchronous>, transform_indices = @transform_0, window_bounds = array<i64: 40, 512>}, {pipeline_mode = #tpu.pipeline_mode<synchronous>, transform_indices = @transform_1, window_bounds = array<i64: 16, 40>}, {pipeline_mode = #tpu.pipeline_mode<synchronous>, transform_indices = @transform_2, window_bounds = array<i64: 8, 1>}, {pipeline_mode = #tpu.pipeline_mode<synchronous>, transform_indices = @transform_3, window_bounds = array<i64: 2, 8, 256>}]} {
    %c0 = arith.constant 0 : index
    %c0_0 = arith.constant 0 : index
    %0 = vector.load %arg2[%c0, %c0_0] : memref<16x40xf32, #tpu.memory_space<vmem>>, vector<16x40xf32>
    %c0_1 = arith.constant 0 : index
    %c0_2 = arith.constant 0 : index
    %1 = vector.load %arg1[%c0_1, %c0_2] : memref<40x512xf32, #tpu.memory_space<vmem>>, vector<40x512xf32>
    %cst = arith.constant dense<0.000000e+00> : vector<16x512xf32>
    %2 = tpu.matmul %0, %1, %cst {dimension_numbers = #tpu.dot_dimension_numbers<[1], [0], [0], [1], [0, 0, 1, 1], [], []>} : vector<16x40xf32>, vector<40x512xf32>, vector<16x512xf32> -> vector<16x512xf32>
    %3 = vector.extract_strided_slice %2 {offsets = [0, 0], sizes = [8, 512], strides = [1, 1]} : vector<16x512xf32> to vector<8x512xf32>
    %4 = vector.extract_strided_slice %2 {offsets = [8, 0], sizes = [8, 512], strides = [1, 1]} : vector<16x512xf32> to vector<8x512xf32>
    %cst_3 = arith.constant 0.000000e+00 : f32
    %5 = vector.broadcast %cst_3 : f32 to vector<8x512xf32>
    %6 = arith.cmpf oge, %3, %5 : vector<8x512xf32>
    %c0_4 = arith.constant 0 : index
    %c0_5 = arith.constant 0 : index
    %7 = vector.load %arg3[%c0_4, %c0_5] : memref<8x1xf32, #tpu.memory_space<vmem>>, vector<8x1xf32>
    %8 = vector.broadcast %7 : vector<8x1xf32> to vector<8x512xf32>
    %9 = arith.mulf %3, %8 : vector<8x512xf32>
    %10 = arith.select %6, %3, %9 : vector<8x512xi1>, vector<8x512xf32>
    %11 = arith.addf %10, %4 : vector<8x512xf32>
    %12 = vector.extract_strided_slice %11 {offsets = [0, 0], sizes = [8, 256], strides = [1, 1]} : vector<8x512xf32> to vector<8x256xf32>
    %c0_6 = arith.constant 0 : index
    %c0_7 = arith.constant 0 : index
    %c0_8 = arith.constant 0 : index
    %13 = vector.load %arg4[%c0_6, %c0_7, %c0_8] : memref<2x8x256xf32, #tpu.memory_space<vmem>>, vector<1x8x256xf32>
    %14 = vector.shape_cast %13 : vector<1x8x256xf32> to vector<8x256xf32>
    %15 = vector.shape_cast %12 : vector<8x256xf32> to vector<1x8x256xf32>
    tpu.vector_store %arg4[%c0_6, %c0_7, %c0_8], %15 {strides = array<i32>} : memref<2x8x256xf32, #tpu.memory_space<vmem>>, vector<1x8x256xf32>,
    %16 = vector.extract_strided_slice %11 {offsets = [0, 256], sizes = [8, 256], strides = [1, 1]} : vector<8x512xf32> to vector<8x256xf32>
    %c1 = arith.constant 1 : index
    %c0_9 = arith.constant 0 : index
    %c0_10 = arith.constant 0 : index
    %17 = vector.load %arg4[%c1, %c0_9, %c0_10] : memref<2x8x256xf32, #tpu.memory_space<vmem>>, vector<1x8x256xf32>
    %18 = vector.shape_cast %17 : vector<1x8x256xf32> to vector<8x256xf32>
    %19 = vector.shape_cast %16 : vector<8x256xf32> to vector<1x8x256xf32>
    tpu.vector_store %arg4[%c1, %c0_9, %c0_10], %19 {strides = array<i32>} : memref<2x8x256xf32, #tpu.memory_space<vmem>>, vector<1x8x256xf32>,
    return
  }
  func.func @transform_0(%arg0: i32) -> (i32, i32) {
    %c0_i32 = arith.constant 0 : i32
    %c0_i32_0 = arith.constant 0 : i32
    %c0_i32_1 = arith.constant 0 : i32
    return %c0_i32, %c0_i32_0 : i32, i32
  }
  func.func @transform_1(%arg0: i32) -> (i32, i32) {
    %c0_i32 = arith.constant 0 : i32
    %c0_i32_0 = arith.constant 0 : i32
    %c0_i32_1 = arith.constant 0 : i32
    return %c0_i32, %c0_i32_0 : i32, i32
  }
  func.func @transform_2(%arg0: i32) -> (i32, i32) {
    %c0_i32 = arith.constant 0 : i32
    %c0_i32_0 = arith.constant 0 : i32
    %c0_i32_1 = arith.constant 0 : i32
    return %c0_i32, %c0_i32_0 : i32, i32
  }
  func.func @transform_3(%arg0: i32) -> (i32, i32, i32) {
    %c0_i32 = arith.constant 0 : i32
    %c0_i32_0 = arith.constant 0 : i32
    %c0_i32_1 = arith.constant 0 : i32
    %c0_i32_2 = arith.constant 0 : i32
    return %c0_i32, %c0_i32_0, %c0_i32_1 : i32, i32, i32
  }
}

</mosaic_0001>

<bundles_post_ra>
// kernel: _residue_block.1
= control target key start
LH: loop header
LB: loop body
LE: loop exit
PB: predicated region body
PF: predicated region fallthrough
CT: control target
= control target key end

     0   :  { %v237_v3 = vmov 0.0   ;;  %vm36_vm0 = vcmask 326656   ;;  %v238_v24 = vmov 0   ;;  %s344_s0 = inlined_call_operand.vmem [shape: f32[40,512], index: 0, kind: input, shape index: {}]   ;;  %s345_s1 = inlined_call_operand.vmem [shape: f32[16,40], index: 1, kind: input, shape index: {}]   ;;  %s346_s2 = inlined_call_operand.vmem [shape: f32[8,1], index: 2, kind: input, shape index: {}]   ;;  %s347_s3 = inlined_call_operand.vmem [shape: f32[2,8,256], index: 3, kind: output, shape index: {}]  }
   0x1   :  { %v33_v0 = vld [vmem:[%s344_s0 + $0x88] sm:$0xff]  ;;  %v35_v1 = vld [vmem:[%s344_s0 + $0x98] sm:$0xff]  ;;  %v32_v2 = vld [vmem:[%s344_s0 + $0x80] sm:$0xff]  ;;  %107 = vmatprep.mubr.f32.mxu0 %v237_v3  ;;  %184 = vmatprep.mubr.f32.mxu1 %v237_v3 }
   0x2   :  { %65 = vmatprep.subr.mxu0 %v33_v0  ;;  %142 = vmatprep.subr.mxu1 %v35_v1  ;;  %v34_v4 = vld [vmem:[%s344_s0 + $0x90] sm:$0xff]  ;;  %v29_v5 = vld [vmem:[%s344_s0 + $0x68] sm:$0xff]  ;;  %v31_v6 = vld [vmem:[%s344_s0 + $0x78] sm:$0xff] }
   0x3   :  { %66 = vmatpush1.msra.mxu0 %v32_v2  ;;  %143 = vmatpush1.msra.mxu1 %v34_v4  ;;  %v28_v7 = vld [vmem:[%s344_s0 + $0x60] sm:$0xff]  ;;  %v30_v8 = vld [vmem:[%s344_s0 + $0x70] sm:$0xff]  ;;  %v25_v9 = vld [vmem:[%s344_s0 + $0x48] sm:$0xff] }
   0x4   :  { %67 = vmatprep.subr.mxu0 %v29_v5  ;;  %144 = vmatprep.subr.mxu1 %v31_v6  ;;  %v27_v10 = vld [vmem:[%s344_s0 + $0x58] sm:$0xff]  ;;  %v24_v11 = vld [vmem:[%s344_s0 + $0x40] sm:$0xff]  ;;  %v26_v12 = vld [vmem:[%s344_s0 + $0x50] sm:$0xff] }
   0x5   :  { %68 = vmatpush1.msra.mxu0 %v28_v7  ;;  %145 = vmatpush1.msra.mxu1 %v30_v8  ;;  %v21_v13 = vld [vmem:[%s344_s0 + $0x28] sm:$0xff]  ;;  %v23_v14 = vld [vmem:[%s344_s0 + $0x38] sm:$0xff]  ;;  %v20_v15 = vld [vmem:[%s344_s0 + $0x20] sm:$0xff] }
   0x6   :  { %69 = vmatprep.subr.mxu0 %v25_v9  ;;  %146 = vmatprep.subr.mxu1 %v27_v10  ;;  %v22_v16 = vld [vmem:[%s344_s0 + $0x30] sm:$0xff]  ;;  %v17_v17 = vld [vmem:[%s344_s0 + $0x8] sm:$0xff]  ;;  %v19_v18 = vld [vmem:[%s344_s0 + $0x18] sm:$0xff] }
   0x7   :  { %70 = vmatpush1.msra.mxu0 %v24_v11  ;;  %147 = vmatpush1.msra.mxu1 %v26_v12  ;;  %v16_v19 = vld [vmem:[%s344_s0] sm:$0xff]  ;;  %v18_v20 = vld [vmem:[%s344_s0 + $0x10] sm:$0xff]  ;;  %v15_v23 = vld [vmem:[%s345_s1 + $0x8] sm:$0xff] }
   0x8   :  { %71 = vmatprep.subr.mxu0 %v21_v13  ;;  %148 = vmatprep.subr.mxu1 %v23_v14  ;;  %v14_v21 = vld [vmem:[%s345_s1] sm:$0xff] }
   0x9   :  { %72 = vmatpush1.msra.mxu0 %v20_v15  ;;  %149 = vmatpush1.msra.mxu1 %v22_v16  ;;  %v201_v22 = vld [vmem:[%s346_s2] sm:$0xff] }
   0xa   :  { %73 = vmatprep.subr.mxu0 %v17_v17  ;;  %150 = vmatprep.subr.mxu1 %v19_v18 }
   0xb   :  { %74 = vmatpush1.msra.mxu0 %v16_v19  ;;  %151 = vmatpush1.msra.mxu1 %v18_v20 }
   0xc   :  { %228 = vmatmul.mubr.msk.f32.vlgmr.msra.gmra.mxu0 %vm36_vm0, %v14_v21  ;;  %230 = vmatmul.mubr.msk.f32.vlgmr.msra.gmra.mxu1 %vm36_vm0, %v14_v21 }
   0xd   :  { %113 = vmatprep.mubr.f32.mxu0 %v237_v3  ;;  %190 = vmatprep.mubr.f32.mxu1 %v237_v3 }
   0xe   :  { %236 = vset.pattern.permute.xlu0 %v238_v24 }
   0xf   :  { %204 = vperm.xlu0 %236, %v201_v22  }
  0x10   :  { %229 = vmatmul.mubr.msk.f32.gmra.mxu0 %vm36_vm0, %v15_v23  ;;  %231 = vmatmul.mubr.msk.f32.gmra.mxu1 %vm36_vm0, %v15_v23 }
  0x8a   :  { %v205_v25 = vpop.permute.xlu0 %204 }
  0xcc   :  { %v109_v26 = vpop.f32.mrf.mxu0  ;;  %v186_v27 = vpop.f32.mrf.mxu1 }
  0xcd   :  { %vm197_vm1 = vcmp.ge.f32.partialorder %v109_v26, 0.0  ;;  %v207_v28 = vmul.f32 %v205_v25, %v109_v26  ;;  %vm199_vm2 = vcmp.ge.f32.partialorder %v186_v27, 0.0  ;;  %v209_v29 = vmul.f32 %v205_v25, %v186_v27 }
  0xce   :  { %v111_v30 = vpop.f32.mrf.mxu0  ;;  %v188_v31 = vpop.f32.mrf.mxu1 }
  0xcf   :  { %vm198_vm3 = vcmp.ge.f32.partialorder %v111_v30, 0.0  ;;  %v208_v32 = vmul.f32 %v205_v25, %v111_v30  ;;  %vm200_vm4 = vcmp.ge.f32.partialorder %v188_v31, 0.0  ;;  %v210_v33 = vmul.f32 %v205_v25, %v188_v31 }
  0xd0   :  { %v115_v34 = vpop.f32.mrf.mxu0  ;;  %v211_v35 = vsel %vm197_vm1, %v109_v26, %v207_v28  ;;  %v192_v36 = vpop.f32.mrf.mxu1  ;;  %v213_v37 = vsel %vm199_vm2, %v186_v27, %v209_v29 }
  0xd1   :  { %v215_v38 = vadd.f32 %v211_v35, %v115_v34  ;;  %v217_v39 = vadd.f32 %v213_v37, %v192_v36  ;;  %v212_v40 = vsel %vm198_vm3, %v111_v30, %v208_v32  ;;  %v214_v41 = vsel %vm200_vm4, %v188_v31, %v210_v33 }
  0xd2   :  { %v117_v42 = vpop.f32.mrf.mxu0  ;;  %v194_v43 = vpop.f32.mrf.mxu1 }
  0xd3   :  { %219 = vst [vmem:[%s347_s3] sm:$0xff] %v215_v38  ;;  %232 = vst [vmem:[%s347_s3 + $0x10] sm:$0xff] %v217_v39  ;;  %v216_v44 = vadd.f32 %v212_v40, %v117_v42  ;;  %v218_v45 = vadd.f32 %v214_v41, %v194_v43 }
  0xd5   :  { %220 = vst [vmem:[%s347_s3 + $0x8] sm:$0xff] %v216_v44  ;;  %233 = vst [vmem:[%s347_s3 + $0x18] sm:$0xff] %v218_v45 }

</bundles_post_ra>
